<compile_context>
chip_gen: v5e
topology: v5e:2x2
jax: 0.10.0
libtpu: 0.0.40
codegen_flags: <defaults>
</compile_context>

<pallas_src>
import jax
import jax.numpy as jnp
from jax.experimental import pallas as pl
from jax.experimental.pallas import tpu as pltpu


# ------------------------------ small helpers ------------------------------

def _round_up(a, b):
    return (a + b - 1) // b * b


def _sublane_multiple(dtype):
    # f32 packs 8 rows per vreg sublane group, bf16 packs 16, int8/fp8 pack 32.
    itemsize = jnp.dtype(dtype).itemsize
    return max(8, 32 // max(1, itemsize))


def _vmem_capacity_bytes():
    """Physical VMEM per TensorCore; conservative 64 MiB (v7x) fallback."""
    try:
        info = pltpu.get_tpu_info()
        for name in ("vmem_capacity_bytes", "vmem_bytes", "vmem_size_bytes"):
            cap = getattr(info, name, None)
            if cap:
                return int(cap)
    except Exception:
        pass
    return 64 * 1024 * 1024


def _num_tensorcores():
    """Number of TensorCores per chip (2 on v7x); safe fallback = 1."""
    try:
        info = pltpu.get_tpu_info()
        for name in ("num_cores", "num_tensorcores", "core_count"):
            n = getattr(info, name, None)
            if n:
                return int(n)
    except Exception:
        pass
    return 1


# ----------------------------- Pallas kernel ------------------------------

def _make_ffn_kernel(red_axis):
    """Builds the fused SwiGLU-FFN kernel; `red_axis` is the grid axis that
    iterates the ffn (reduction) chunks (1 for the 2-D grid, 2 for the
    core-split 3-D grid)."""

    def kernel(x_ref, gate_ref, up_ref, down_ref, o_ref, acc_ref):
        # x_ref:    (tm, D)  activation row tile (same block across ffn axis)
        # gate_ref: (D, tf)  gate_proj weight chunk (transposed layout)
        # up_ref:   (D, tf)  up_proj weight chunk
        # down_ref: (tf, D)  down_proj weight chunk
        # o_ref:    (tm, D)  output row tile (lane-dense: full D on lanes)
        # acc_ref:  (tm, D)  f32 accumulator scratch, persists across ffn axis
        j = pl.program_id(red_axis)

        @pl.when(j == 0)
        def _():
            acc_ref[...] = jnp.zeros_like(acc_ref)

        x = x_ref[...]                                    # native dtype -> MXU
        g = jnp.dot(x, gate_ref[...], preferred_element_type=jnp.float32)
        u = jnp.dot(x, up_ref[...], preferred_element_type=jnp.float32)
        h = (g * jax.nn.sigmoid(g)) * u                   # SiLU(gate) * up (f32)
        acc_ref[...] += jnp.dot(h.astype(down_ref.dtype), down_ref[...],
                                preferred_element_type=jnp.float32)

        @pl.when(j == pl.num_programs(red_axis) - 1)
        def _():
            o_ref[...] = acc_ref[...].astype(o_ref.dtype)

    return kernel


# --------------------------- weight preparation ----------------------------

def prepare_ffn_weights(gate_w, up_w, down_w, *, ffn_multiple=256):
    """One-time conversion of PyTorch nn.Linear weights to kernel layout.

    gate_w, up_w: (F, D);  down_w: (D, F)   (out_features, in_features), no bias
    Returns (gate_t, up_t, down_t) of shapes (D, Fp), (D, Fp), (Fp, D) with
    Fp = round_up(F, ffn_multiple).  Zero padding is exact: padded ffn columns
    give silu(0)*0 = 0 and map to zero rows of down_t.
    Call this ONCE at parameter-load time so per-call HBM traffic is only the
    streamed weight reads (no per-call transposed copies).
    """
    F, D = gate_w.shape
    assert up_w.shape == (F, D) and down_w.shape == (D, F)
    Fp = _round_up(F, ffn_multiple)
    gate_t = jnp.swapaxes(gate_w, 0, 1)    # (D, F)
    up_t = jnp.swapaxes(up_w, 0, 1)        # (D, F)
    down_t = jnp.swapaxes(down_w, 0, 1)    # (F, D)
    if Fp != F:
        gate_t = jnp.pad(gate_t, ((0, 0), (0, Fp - F)))
        up_t = jnp.pad(up_t, ((0, 0), (0, Fp - F)))
        down_t = jnp.pad(down_t, ((0, Fp - F), (0, 0)))
    return gate_t, up_t, down_t


# ------------------------------ tile picking -------------------------------

def _pick_tiles(T, D, F, x_dtype, w_dtype, out_dtype,
                block_rows, block_ffn, vmem_limit_bytes):
    sub = _sublane_multiple(x_dtype)
    tm = min(block_rows, _round_up(T, sub))
    if tm >= 128:
        tm = _round_up(tm, 128)            # full MXU rows for large T

    # Largest tf <= block_ffn that is a multiple of 128 and divides F.
    tf = max(128, min(block_ffn, F) // 128 * 128)
    while tf > 128 and F % tf != 0:
        tf -= 128

    x_b = jnp.dtype(x_dtype).itemsize
    w_b = jnp.dtype(w_dtype).itemsize
    o_b = jnp.dtype(out_dtype).itemsize

    def working_set(tm_, tf_):
        return (2 * tm_ * D * x_b            # double-buffered activation tile
                + 2 * tm_ * D * o_b          # double-buffered output tile
                + 2 * 3 * D * tf_ * w_b      # gate/up/down chunks, double-buffered
                + tm_ * D * 4)               # f32 accumulator scratch

    budget = max(8 << 20, vmem_limit_bytes - (4 << 20))  # leave internal-scratch room
    while working_set(tm, tf) > budget and tf > 128:
        nf = tf - 128
        while nf > 128 and F % nf != 0:
            nf -= 128
        tf = nf
    while working_set(tm, tf) > budget and tm > sub:
        tm = max(sub, _round_up(tm // 2, sub))
    return tm, tf


# --------------------------------- wrapper ---------------------------------

def swiglu_ffn(x, gate_t, up_t, down_t, *, block_rows=None, block_ffn=None,
               ffn_splits=None, vmem_limit_bytes=None, interpret=False):
    """down_proj(silu(gate_proj(x)) * up_proj(x)) with kernel-layout weights.

    x:       (..., D)
    gate_t:  (D, F)   (from prepare_ffn_weights)
    up_t:    (D, F)
    down_t:  (F, D)
    """
    D = x.shape[-1]
    F = gate_t.shape[1]
    assert gate_t.shape == (D, F) and up_t.shape == (D, F) and down_t.shape == (F, D)

    if F % 128 != 0:
        # Caller skipped prepare_ffn_weights; pad here (per-call cost — prefer
        # doing this once at load time).
        Fp = _round_up(F, 128)
        gate_t = jnp.pad(gate_t, ((0, 0), (0, Fp - F)))
        up_t = jnp.pad(up_t, ((0, 0), (0, Fp - F)))
        down_t = jnp.pad(down_t, ((0, Fp - F), (0, 0)))
        F = Fp

    # Generation-aware defaults: v5e/v6e have 128 MiB physical VMEM, v7x 64 MiB.
    cap = _vmem_capacity_bytes()
    big_vmem = cap >= (96 << 20)
    if vmem_limit_bytes is None:
        vmem_limit_bytes = max(32 << 20, min(cap - (8 << 20), 110 << 20))
    if block_rows is None:
        block_rows = 1024 if big_vmem else 512
    if block_ffn is None:
        block_ffn = 512 if big_vmem else 256

    lead_shape = x.shape[:-1]
    x2 = x.reshape(-1, D)
    T = x2.shape[0]

    tm, tf = _pick_tiles(T, D, F, x2.dtype, gate_t.dtype, x.dtype,
                         block_rows, block_ffn, vmem_limit_bytes)

    t_pad = _round_up(T, tm)
    if t_pad != T:
        x2 = jnp.pad(x2, ((0, t_pad - T), (0, 0)))

    n_rows = t_pad // tm
    n_ffn = F // tf

    # Decode / single-row-tile case: split the ffn reduction across cores via a
    # leading "parallel" grid axis so a 2-TC chip (v7x) does not idle one core.
    if ffn_splits is None:
        ffn_splits = _num_tensorcores() if n_rows == 1 else 1
    splits = int(ffn_splits)
    if splits < 2 or n_rows != 1 or n_ffn % splits != 0:
        splits = 1

    if splits == 1:
        out = pl.pallas_call(
            _make_ffn_kernel(red_axis=1),
            out_shape=jax.ShapeDtypeStruct((t_pad, D), x.dtype),
            grid=(n_rows, n_ffn),
            in_specs=[
                pl.BlockSpec((tm, D), lambda i, j: (i, 0)),   # activations
                pl.BlockSpec((D, tf), lambda i, j: (0, j)),   # gate_proj chunk
                pl.BlockSpec((D, tf), lambda i, j: (0, j)),   # up_proj chunk
                pl.BlockSpec((tf, D), lambda i, j: (j, 0)),   # down_proj chunk
            ],
            out_specs=pl.BlockSpec((tm, D), lambda i, j: (i, 0)),
            scratch_shapes=[pltpu.VMEM((tm, D), jnp.float32)],
            compiler_params=pltpu.CompilerParams(
                dimension_semantics=("parallel", "arbitrary"),
                vmem_limit_bytes=vmem_limit_bytes),
            interpret=interpret,
        )(x2, gate_t, up_t, down_t)
    else:
        n_per = n_ffn // splits
        parts = pl.pallas_call(
            _make_ffn_kernel(red_axis=2),
            out_shape=jax.ShapeDtypeStruct((splits, t_pad, D), jnp.float32),
            grid=(splits, n_rows, n_per),
            in_specs=[
                pl.BlockSpec((tm, D), lambda c, i, j: (i, 0)),
                pl.BlockSpec((D, tf), lambda c, i, j: (0, c * n_per + j)),
                pl.BlockSpec((D, tf), lambda c, i, j: (0, c * n_per + j)),
                pl.BlockSpec((tf, D), lambda c, i, j: (c * n_per + j, 0)),
            ],
            out_specs=pl.BlockSpec((None, tm, D), lambda c, i, j: (c, i, 0)),
            scratch_shapes=[pltpu.VMEM((tm, D), jnp.float32)],
            compiler_params=pltpu.CompilerParams(
                dimension_semantics=("parallel", "parallel", "arbitrary"),
                vmem_limit_bytes=vmem_limit_bytes),
            interpret=interpret,
        )(x2, gate_t, up_t, down_t)
        out = parts.sum(axis=0).astype(x.dtype)   # tiny f32 partial-sum (decode)

    if t_pad != T:
        out = out[:T]
    return out.reshape(*lead_shape, D)


def feed_forward_network(x, gate_w, up_w, down_w, **kwargs):
    """Convenience: accepts PyTorch nn.Linear layout (out_features, in_features).
    For repeated calls, use prepare_ffn_weights() once and call swiglu_ffn()."""
    gate_t, up_t, down_t = prepare_ffn_weights(gate_w, up_w, down_w)
    return swiglu_ffn(x, gate_t, up_t, down_t, **kwargs)


# --------------------------- pure-JAX reference ----------------------------

def swiglu_ffn_ref(x, gate_w, up_w, down_w):
    g = x @ gate_w.T
    u = x @ up_w.T
    return (jax.nn.silu(g) * u) @ down_w.T


# --------------------------------- demo ------------------------------------

if __name__ == "__main__":
    key = jax.random.PRNGKey(0)
    k1, k2, k3, k4 = jax.random.split(key, 4)

    # Small shapes; F=400 exercises the ffn-axis padding path (pads to 512).
    B, S, D, F = 2, 8, 128, 400
    x = jax.random.normal(k1, (B, S, D), jnp.float32)
    gate_w = jax.random.normal(k2, (F, D), jnp.float32) * 0.05
    up_w = jax.random.normal(k3, (F, D), jnp.float32) * 0.05
    down_w = jax.random.normal(k4, (D, F), jnp.float32) * 0.05

    ref = swiglu_ffn_ref(x, gate_w, up_w, down_w)

    # One-time weight prep (transpose + pad) hoisted out of the per-call path.
    gate_t, up_t, down_t = prepare_ffn_weights(gate_w, up_w, down_w)

    # Path 1: streamed ffn reduction, grid = (row_tiles, ffn_chunks) = (1, 2).
    out1 = swiglu_ffn(x, gate_t, up_t, down_t,
                      block_rows=256, block_ffn=256, ffn_splits=1)
    out1 = jax.block_until_ready(out1)

    # Path 2: decode-style split of the ffn reduction across TensorCores,
    # grid = (2, 1, 1); per-split f32 partials summed outside the kernel.
    out2 = swiglu_ffn(x, gate_t, up_t, down_t,
                      block_rows=256, block_ffn=256, ffn_splits=2)
    out2 = jax.block_until_ready(out2)

    for out in (out1, out2):
        assert out.shape == (B, S, D)
        assert bool(jnp.all(jnp.isfinite(out)))
        rel_err = float(jnp.max(jnp.abs(out - ref)) /
                        (jnp.max(jnp.abs(ref)) + 1e-6))
        assert rel_err < 2e-2, f"mismatch vs reference: rel_err={rel_err}"

    # bf16 smoke test (production dtype path; sublane packing = 16).
    out_bf16 = feed_forward_network(
        x.astype(jnp.bfloat16), gate_w.astype(jnp.bfloat16),
        up_w.astype(jnp.bfloat16), down_w.astype(jnp.bfloat16),
        block_rows=256, block_ffn=256, ffn_splits=1)
    out_bf16 = jax.block_until_ready(out_bf16)
    assert out_bf16.shape == (B, S, D)
    assert bool(jnp.all(jnp.isfinite(out_bf16.astype(jnp.float32))))
    rel_err = float(jnp.max(jnp.abs(out_bf16.astype(jnp.float32) - ref)) /
                    (jnp.max(jnp.abs(ref)) + 1e-6))
    assert rel_err < 1e-1, f"bf16 mismatch vs reference: rel_err={rel_err}"

    print("KERNEL_OK")
</pallas_src>

<mosaic_0001>
module attributes {stable_mosaic.version = 11 : i64} {
  func.func @kernel(%arg0: i32, %arg1: i32, %arg2: memref<16x128xf32, #tpu.memory_space<vmem>>, %arg3: memref<128x256xf32, #tpu.memory_space<vmem>>, %arg4: memref<128x256xf32, #tpu.memory_space<vmem>>, %arg5: memref<256x128xf32, #tpu.memory_space<vmem>>, %arg6: memref<16x128xf32, #tpu.memory_space<vmem>>, %arg7: memref<16x128xf32, #tpu.memory_space<vmem>>) attributes {dimension_semantics = [#tpu.dimension_semantics<parallel>, #tpu.dimension_semantics<arbitrary>], iteration_bounds = array<i64: 1, 2>, scalar_prefetch = 0 : i64, scratch_operands = 1 : i64, tpu.core_type = #tpu.core_type<tc>, window_params = [{transform_indices = @transform_0, window_bounds = array<i64: 16, 128>}, {transform_indices = @transform_1, window_bounds = array<i64: 128, 256>}, {transform_indices = @transform_2, window_bounds = array<i64: 128, 256>}, {transform_indices = @transform_3, window_bounds = array<i64: 256, 128>}, {transform_indices = @transform_4, window_bounds = array<i64: 16, 128>}]} {
    %c0_i32 = arith.constant 0 : i32
    %0 = arith.cmpi eq, %arg1, %c0_i32 : i32
    %1 = arith.extui %0 : i1 to i32
    %c0_i32_0 = arith.constant 0 : i32
    %2 = arith.cmpi ne, %1, %c0_i32_0 : i32
    scf.if %2 {
      %cst_16 = arith.constant 0.000000e+00 : f32
      %23 = vector.broadcast %cst_16 : f32 to vector<16x128xf32>
      %c0_17 = arith.constant 0 : index
      %c0_18 = arith.constant 0 : index
      %24 = vector.load %arg7[%c0_17, %c0_18] : memref<16x128xf32, #tpu.memory_space<vmem>>, vector<16x128xf32>
      tpu.vector_store %arg7[%c0_17, %c0_18], %23 {strides = array<i32>} : memref<16x128xf32, #tpu.memory_space<vmem>>, vector<16x128xf32>,
    } else {
    }
    %c0 = arith.constant 0 : index
    %c0_1 = arith.constant 0 : index
    %3 = vector.load %arg2[%c0, %c0_1] : memref<16x128xf32, #tpu.memory_space<vmem>>, vector<16x128xf32>
    %c0_2 = arith.constant 0 : index
    %c0_3 = arith.constant 0 : index
    %4 = vector.load %arg3[%c0_2, %c0_3] : memref<128x256xf32, #tpu.memory_space<vmem>>, vector<128x256xf32>
    %cst = arith.constant dense<0.000000e+00> : vector<16x256xf32>
    %5 = tpu.matmul %3, %4, %cst {dimension_numbers = #tpu.dot_dimension_numbers<[1], [0], [0], [1], [0, 0, 1, 1], [], []>} : vector<16x128xf32>, vector<128x256xf32>, vector<16x256xf32> -> vector<16x256xf32>
    %c0_4 = arith.constant 0 : index
    %c0_5 = arith.constant 0 : index
    %6 = vector.load %arg4[%c0_4, %c0_5] : memref<128x256xf32, #tpu.memory_space<vmem>>, vector<128x256xf32>
    %cst_6 = arith.constant dense<0.000000e+00> : vector<16x256xf32>
    %7 = tpu.matmul %3, %6, %cst_6 {dimension_numbers = #tpu.dot_dimension_numbers<[1], [0], [0], [1], [0, 0, 1, 1], [], []>} : vector<16x128xf32>, vector<128x256xf32>, vector<16x256xf32> -> vector<16x256xf32>
    %8 = arith.negf %5 : vector<16x256xf32>
    %9 = math.exp %8 : vector<16x256xf32>
    %cst_7 = arith.constant 1.000000e+00 : f32
    %10 = vector.broadcast %cst_7 : f32 to vector<16x256xf32>
    %11 = arith.addf %10, %9 : vector<16x256xf32>
    %12 = arith.divf %10, %11 : vector<16x256xf32>
    %13 = arith.mulf %5, %12 : vector<16x256xf32>
    %14 = arith.mulf %13, %7 : vector<16x256xf32>
    %c0_8 = arith.constant 0 : index
    %c0_9 = arith.constant 0 : index
    %15 = vector.load %arg7[%c0_8, %c0_9] : memref<16x128xf32, #tpu.memory_space<vmem>>, vector<16x128xf32>
    %c0_10 = arith.constant 0 : index
    %c0_11 = arith.constant 0 : index
    %16 = vector.load %arg5[%c0_10, %c0_11] : memref<256x128xf32, #tpu.memory_space<vmem>>, vector<256x128xf32>
    %cst_12 = arith.constant dense<0.000000e+00> : vector<16x128xf32>
    %17 = tpu.matmul %14, %16, %cst_12 {dimension_numbers = #tpu.dot_dimension_numbers<[1], [0], [0], [1], [0, 0, 1, 1], [], []>} : vector<16x256xf32>, vector<256x128xf32>, vector<16x128xf32> -> vector<16x128xf32>
    %18 = arith.addf %15, %17 : vector<16x128xf32>
    %c0_13 = arith.constant 0 : index
    %c0_14 = arith.constant 0 : index
    %19 = vector.load %arg7[%c0_13, %c0_14] : memref<16x128xf32, #tpu.memory_space<vmem>>, vector<16x128xf32>
    tpu.vector_store %arg7[%c0_13, %c0_14], %18 {strides = array<i32>} : memref<16x128xf32, #tpu.memory_space<vmem>>, vector<16x128xf32>,
    %c1_i32 = arith.constant 1 : i32
    %20 = arith.cmpi eq, %arg1, %c1_i32 : i32
    %21 = arith.extui %20 : i1 to i32
    %c0_i32_15 = arith.constant 0 : i32
    %22 = arith.cmpi ne, %21, %c0_i32_15 : i32
    scf.if %22 {
      %c0_16 = arith.constant 0 : index
      %c0_17 = arith.constant 0 : index
      %23 = vector.load %arg7[%c0_16, %c0_17] : memref<16x128xf32, #tpu.memory_space<vmem>>, vector<16x128xf32>
      %c0_18 = arith.constant 0 : index
      %c0_19 = arith.constant 0 : index
      %24 = vector.load %arg6[%c0_18, %c0_19] : memref<16x128xf32, #tpu.memory_space<vmem>>, vector<16x128xf32>
      tpu.vector_store %arg6[%c0_18, %c0_19], %23 {strides = array<i32>} : memref<16x128xf32, #tpu.memory_space<vmem>>, vector<16x128xf32>,
    } else {
    }
    return
  }
  func.func @transform_0(%arg0: i32, %arg1: i32) -> (i32, i32) {
    %c0_i32 = arith.constant 0 : i32
    %c0_i32_0 = arith.constant 0 : i32
    return %arg0, %c0_i32 : i32, i32
  }
  func.func @transform_1(%arg0: i32, %arg1: i32) -> (i32, i32) {
    %c0_i32 = arith.constant 0 : i32
    %c0_i32_0 = arith.constant 0 : i32
    return %c0_i32, %arg1 : i32, i32
  }
  func.func @transform_2(%arg0: i32, %arg1: i32) -> (i32, i32) {
    %c0_i32 = arith.constant 0 : i32
    %c0_i32_0 = arith.constant 0 : i32
    return %c0_i32, %arg1 : i32, i32
  }
  func.func @transform_3(%arg0: i32, %arg1: i32) -> (i32, i32) {
    %c0_i32 = arith.constant 0 : i32
    %c0_i32_0 = arith.constant 0 : i32
    return %arg1, %c0_i32 : i32, i32
  }
  func.func @transform_4(%arg0: i32, %arg1: i32) -> (i32, i32) {
    %c0_i32 = arith.constant 0 : i32
    %c0_i32_0 = arith.constant 0 : i32
    return %arg0, %c0_i32 : i32, i32
  }
}

</mosaic_0001>

<bundles_post_ra>
// kernel: tpu_custom_call.1
= control target key start
LH: loop header
LB: loop body
LE: loop exit
PB: predicated region body
PF: predicated region fallthrough
CT: control target
= control target key end

     0   :  { %s1499_s0 = inlined_call_operand.hbm [shape: f32[16,128], index: 0, kind: input, shape index: {}]   ;;  %s1500_s1 = inlined_call_operand.hbm [shape: f32[128,512], index: 1, kind: input, shape index: {}]   ;;  %s1501_s2 = inlined_call_operand.hbm [shape: f32[128,512], index: 2, kind: input, shape index: {}]   ;;  %s1502_s3 = inlined_call_operand.hbm [shape: f32[512,128], index: 3, kind: input, shape index: {}]   ;;  %s1503_s4 = inlined_call_operand.hbm [shape: f32[16,128], index: 4, kind: output, shape index: {}]  }
   0x1   :  { %1506 = sst [smem:[#allocation18_spill]] %s1499_s0 }
   0x2   :  { %1507 = sst [smem:[#allocation19_spill]] %s1500_s1 }
   0x3   :  { %1508 = sst [smem:[#allocation20_spill]] %s1501_s2 }
   0x4   :  { %9 = vsyncpa [#allocation4], 0 }
   0x5   :  { %10 = vsyncpa [#allocation7], 0 }
   0x6   :  { %12 = vsyncpa [#allocation7 + $0x1], 0 }
   0x7   :  { %13 = vsyncpa [#allocation10], 0 }
   0x8   :  { %15 = vsyncpa [#allocation10 + $0x1], 0 }
   0x9   :  { %16 = vsyncpa [#allocation5], 0  ;;  %s1223_s15 = smov 0   ;;  %s1225_s16 = smov 0  }
   0xa   :  { %s1227_s17 = smov 0   ;;  %s1229_s18 = smov 0  }
   0xb   :  { %s1231_s19 = smov 0   ;;  %s1233_s20 = smov 0  }
   0xc LB: > { %s31_s21 = sadd.s32 1, %s1182_s19  ;;  %s67_s22 = sadd.s32 1, %s1174_s17  ;;  %s1186_s20 = sphi %s1233_s20, %s22_s20   ;;  %s1182_s19 = sphi %s1231_s19, %s1525_s19   ;;  %s1178_s18 = sphi %s1229_s18, %s1524_s18   ;;  %s1174_s17 = sphi %s1227_s17, %s1523_s17   ;;  %s1170_s16 = sphi %s1225_s16, %s1522_s16   ;;  %s1166_s15 = sphi %s1223_s15, %s1521_s15  }
   0xd   : > { %p32_p0 = scmp.ge.s32.totalorder %s31_s21, 2  ;;  %p74_p1 = scmp.ne.s32.totalorder %s1174_s17, %s1170_s16 }
   0xe   : > { %p75_p2 = scmp.eq.s32.totalorder %s1186_s20, 0  ;;  %p898_p4 = scmp.lt.s32.totalorder %s1186_s20, 2 }
   0xf   : > { %s1527_s21 = smov (%p32_p0, %s31_s21), 0  ;;  %s199_s25 = sand.u32 1, %s1186_s20  }
  0x10   : > { %1509 = sst [smem:[#allocation16_spill]] %s1527_s21  ;;  %p1260_p3 = por %p75_p2, %p74_p1 }
  0x11   : > { %s64_s24 = ssub.s32 %s1182_s19, %s1527_s21  ;;  %s1504_s26 = sand.u32 1, %s1174_s17  }
  0x12   : > { %p65_p5 = scmp.eq.s32.totalorder %s64_s24, 0  ;;  %s834_s27 = sshll.u32 %s1182_s19, 4 }
  0x13   : > { %s1275_s29 = sshll.u32 %s1504_s26, 8  ;;  %s1512_s1 = sld [smem:[#allocation19_spill]] }
  0x14   : > { %s1271_s28 = scalar_select %p65_p5, %s1174_s17, %s67_s22  }
  0x15   : > { %s203_s8 = scalar_lea.vmem [#allocation6], %s1275_s29  ;;  %p1285_p6 = pnand %p898_p4, %p1260_p3 }
  0x16   : > { %1511 = sst [smem:[#allocation17_spill]] %s1271_s28  ;;  %s211_s9 = sshll.u32 %s203_s8, 4  ;;  %s212_s9 = int_to_ptr.vmem [resolvable:$true] %s211_s9 }
  0x17   : > { %s1289_s11 = scalar_lea.sflag [#allocation7], %s199_s25  ;;  %s1188_s12 = smov 512  }
  0x18   : > { %s1189_s13 = smov 256   ;;  %s1190_s14 = smov 16  }
  0x19   : > { %s208_s6 = scalar_lea.hbm %s1512_s1, %s834_s27  ;;  %s1514_s2 = sld [smem:[#allocation20_spill]] }
  0x1a   : > { %s209_s7 = sshll.u32 %s208_s6, 4  ;;  %s1301_s5 = sadd.s32 4294967295, %s1186_s20   ;;  %s210_s7 = int_to_ptr.hbm [resolvable:$true] %s209_s7 }
  0x1b   : > { %890 = dma.hbm_to_vmem [thread:$0]  (!%p1285_p6), %s210_s7, 4096, %s212_s9, %s1289_s11, %s1188_s12, %s1189_s13, %s1190_s14  }
  0x1c   : > { %p80_p7 = scmp.ne.s32.totalorder %s1170_s16, %s1166_s15  ;;  %p81_p8 = scmp.eq.s32.totalorder %s1301_s5, 0 }
  0x1d   : > { %p807_p9 = scmp.ge.s32.totalorder %s1186_s20, 1  ;;  %p169_p10 = scmp.lt.s32.totalorder %s1186_s20, 3 }
  0x1e   : > { %p1310_p11 = por %p81_p8, %p80_p7  ;;  %s1517_s0 = sld [smem:[#allocation18_spill]] }
  0x1f   : > { %s230_s23 = scalar_lea.hbm %s1514_s2, %s834_s27  ;;  %p1314_p12 = pnand %p807_p9, %p169_p10 }
  0x20   : > { %s231_s30 = sshll.u32 %s230_s23, 4  ;;  %s1191_s8 = smov [#allocation3]   ;;  %s232_s30 = int_to_ptr.hbm [resolvable:$true] %s231_s30 }
  0x21   : > { %p883_p13 = pneg %p1314_p12  ;;  %s185_s9 = sshll.u32 %s1191_s8, 4  ;;  %s186_s9 = int_to_ptr.vmem [resolvable:$true] %s185_s9 }
  0x22   : > { %s225_s22 = scalar_lea.vmem [#allocation8], %s1275_s29  ;;  %s1192_s23 = smov 128  }
  0x23   : > { %p884_p0 = pnand %p883_p13, %p81_p8  ;;  %s233_s24 = sshll.u32 %s225_s22, 4  ;;  %s234_s24 = int_to_ptr.vmem [resolvable:$true] %s233_s24 }
  0x24   : > { %s183_s15 = sshll.u32 %s1517_s0, 4  ;;  %s1193_s26 = smov 8   ;;  %s184_s15 = int_to_ptr.hbm [resolvable:$true] %s183_s15 }
  0x25   : > { %886 = dma.hbm_to_vmem [thread:$0]  (!%p884_p0), %s184_s15, 256, %s186_s9, [#allocation4], %s1192_s23, %s1192_s23, %s1193_s26  }
  0x26   : > { %893 = dma.hbm_to_vmem [thread:$0]  (!%p1285_p6), %s232_s30, 4096, %s234_s24, %s1289_s11, %s1188_s12, %s1189_s13, %s1190_s14  }
  0x27   : > { %s836_s6 = sshll.u32 %s1182_s19, 8  ;;  %s247_s7 = scalar_lea.vmem [#allocation9], %s1275_s29 }
  0x28   : > { %s255_s0 = sshll.u32 %s247_s7, 4  ;;  %s252_s2 = scalar_lea.hbm %s1502_s3, %s836_s6  ;;  %s256_s0 = int_to_ptr.vmem [resolvable:$true] %s255_s0 }
  0x29   : > { %s253_s21 = sshll.u32 %s252_s2, 4  ;;  %s1518_s22 = sand.u32 1, %s1174_s17   ;;  %s254_s21 = int_to_ptr.hbm [resolvable:$true] %s253_s21 }
  0x2a   : > { %s244_s28 = scalar_lea.sflag [#allocation10], %s1518_s22  ;;  %267 = sbr.rel (%p1314_p12) target bundleno = 417 (0x1a1), region = 36 }
  0x2b   : > { %896 = dma.hbm_to_vmem [thread:$0]  (!%p1285_p6), %s254_s21, 4096, %s256_s0, %s244_s28, %s1192_s23, %s1192_s23, %s1193_s26  }
  0x2f   : > { %1149 = dma.done.wait (%p81_p8), [#allocation4], 256  }
  0x30   : > { %1151 = vsyncadd (%p81_p8), [#allocation4], 4294967040  ;;  %s274_s1 = sand.u32 1, %s1301_s5   ;;  %s276_s29 = sand.u32 1, %s1170_s16  }
  0x31   : > { %s821_s2 = sshll.u32 %s276_s29, 8  ;;  %s275_s11 = scalar_lea.sflag [#allocation7], %s274_s1 }
  0x32   : > { %s1349_s12 = scalar_lea.vmem [#allocation6], %s821_s2 }
  0x33   : > { %1153 = dma.done.wait (%p1310_p11), %s275_s11, 8192  }
  0x34   : > { %1155 = vsyncadd (%p1310_p11), %s275_s11, 4294959104  ;;  %s1355_s0 = scalar_lea.vmem [#allocation8], %s821_s2  ;;  %s295_s21 = scalar_lea.sflag [#allocation10], %s276_s29 }
  0x35   : > { %s1357_s26 = scalar_lea.vmem [#allocation9], %s821_s2 }
  0x36   : > { %1157 = dma.done.wait (%p1310_p11), %s295_s21, 4096  }
  0x37   : > { %1159 = vsyncadd (%p1310_p11), %s295_s21, 4294963200  ;;  %p824_p1 = scmp.ne.s32.totalorder %s1178_s18, 0 }
  0x39   : > { %337 = sbr.rel (%p824_p1) target bundleno = 65 (0x41), region = 56 }
  0x3e   : > { %v1194_v0 = vmov 0.0  }
  0x3f   : > { %338 = vst [vmem:[#allocation2] sm:$0xff] %v1194_v0 }
  0x40   : > { %339 = vst [vmem:[#allocation2 + $0x8] sm:$0xff] %v1194_v0 }
  0x41 PF: > { %v372_v1 = vld [vmem:[%s1349_s12 + $0xf0] sm:$0xff]  ;;  %v373_v2 = vld [vmem:[%s1349_s12 + $0xf8] sm:$0xff]  ;;  %v370_v3 = vld [vmem:[%s1349_s12 + $0xe0] sm:$0xff]  ;;  %p829_p2 = scmp.ne.s32.totalorder %s1178_s18, 1 }
  0x42   : > { %374 = vmatpush.msra.mxu0 %v372_v1  ;;  %397 = vmatpush.msra.mxu1 %v373_v2  ;;  %v371_v4 = vld [vmem:[%s1349_s12 + $0xe8] sm:$0xff]  ;;  %v368_v5 = vld [vmem:[%s1349_s12 + $0xd0] sm:$0xff]  ;;  %v369_v6 = vld [vmem:[%s1349_s12 + $0xd8] sm:$0xff] }
  0x43   : > { %v366_v7 = vld [vmem:[%s1349_s12 + $0xc0] sm:$0xff]  ;;  %v367_v8 = vld [vmem:[%s1349_s12 + $0xc8] sm:$0xff]  ;;  %v364_v9 = vld [vmem:[%s1349_s12 + $0xb0] sm:$0xff] }
  0x44   : > { %375 = vmatpush.msra.mxu0 %v370_v3  ;;  %398 = vmatpush.msra.mxu1 %v371_v4  ;;  %v365_v10 = vld [vmem:[%s1349_s12 + $0xb8] sm:$0xff]  ;;  %v362_v11 = vld [vmem:[%s1349_s12 + $0xa0] sm:$0xff]  ;;  %v363_v12 = vld [vmem:[%s1349_s12 + $0xa8] sm:$0xff] }
  0x45   : > { %v450_v13 = vld [vmem:[%s1355_s0 + $0xf0] sm:$0xff]  ;;  %v451_v15 = vld [vmem:[%s1355_s0 + $0xf8] sm:$0xff]  ;;  %v448_v17 = vld [vmem:[%s1355_s0 + $0xe0] sm:$0xff] }
  0x46   : > { %376 = vmatpush.msra.mxu0 %v368_v5  ;;  %399 = vmatpush.msra.mxu1 %v369_v6  ;;  %v360_v14 = vld [vmem:[%s1349_s12 + $0x90] sm:$0xff]  ;;  %v361_v16 = vld [vmem:[%s1349_s12 + $0x98] sm:$0xff]  ;;  %v449_v18 = vld [vmem:[%s1355_s0 + $0xe8] sm:$0xff] }
  0x47   : > { %452 = vmatpush.msra.mxu2 %v450_v13  ;;  %475 = vmatpush.msra.mxu3 %v451_v15  ;;  %v446_v19 = vld [vmem:[%s1355_s0 + $0xd0] sm:$0xff]  ;;  %v447_v20 = vld [vmem:[%s1355_s0 + $0xd8] sm:$0xff]  ;;  %v358_v21 = vld [vmem:[%s1349_s12 + $0x80] sm:$0xff] }
  0x48   : > { %377 = vmatpush.msra.mxu0 %v366_v7  ;;  %400 = vmatpush.msra.mxu1 %v367_v8  ;;  %v359_v22 = vld [vmem:[%s1349_s12 + $0x88] sm:$0xff]  ;;  %v444_v23 = vld [vmem:[%s1355_s0 + $0xc0] sm:$0xff]  ;;  %v356_v25 = vld [vmem:[%s1349_s12 + $0x70] sm:$0xff] }
  0x49   : > { %453 = vmatpush.msra.mxu2 %v448_v17  ;;  %476 = vmatpush.msra.mxu3 %v449_v18  ;;  %v445_v24 = vld [vmem:[%s1355_s0 + $0xc8] sm:$0xff]  ;;  %v357_v26 = vld [vmem:[%s1349_s12 + $0x78] sm:$0xff]  ;;  %v442_v27 = vld [vmem:[%s1355_s0 + $0xb0] sm:$0xff] }
  0x4a   : > { %378 = vmatpush.msra.mxu0 %v364_v9  ;;  %401 = vmatpush.msra.mxu1 %v365_v10  ;;  %v443_v28 = vld [vmem:[%s1355_s0 + $0xb8] sm:$0xff]  ;;  %v354_v29 = vld [vmem:[%s1349_s12 + $0x60] sm:$0xff]  ;;  %v355_v30 = vld [vmem:[%s1349_s12 + $0x68] sm:$0xff] }
  0x4b   : > { %454 = vmatpush.msra.mxu2 %v446_v19  ;;  %477 = vmatpush.msra.mxu3 %v447_v20  ;;  %v440_v31 = vld [vmem:[%s1355_s0 + $0xa0] sm:$0xff]  ;;  %v441_v32 = vld [vmem:[%s1355_s0 + $0xa8] sm:$0xff]  ;;  %v352_v33 = vld [vmem:[%s1349_s12 + $0x50] sm:$0xff] }
  0x4c   : > { %379 = vmatpush.msra.mxu0 %v362_v11  ;;  %402 = vmatpush.msra.mxu1 %v363_v12  ;;  %v353_v34 = vld [vmem:[%s1349_s12 + $0x58] sm:$0xff]  ;;  %v438_v35 = vld [vmem:[%s1355_s0 + $0x90] sm:$0xff]  ;;  %v350_v37 = vld [vmem:[%s1349_s12 + $0x40] sm:$0xff] }
  0x4d   : > { %455 = vmatpush.msra.mxu2 %v444_v23  ;;  %478 = vmatpush.msra.mxu3 %v445_v24  ;;  %v439_v36 = vld [vmem:[%s1355_s0 + $0x98] sm:$0xff]  ;;  %v351_v38 = vld [vmem:[%s1349_s12 + $0x48] sm:$0xff]  ;;  %v436_v39 = vld [vmem:[%s1355_s0 + $0x80] sm:$0xff] }
  0x4e   : > { %380 = vmatpush.msra.mxu0 %v360_v14  ;;  %403 = vmatpush.msra.mxu1 %v361_v16  ;;  %v437_v40 = vld [vmem:[%s1355_s0 + $0x88] sm:$0xff]  ;;  %v348_v41 = vld [vmem:[%s1349_s12 + $0x30] sm:$0xff]  ;;  %v349_v42 = vld [vmem:[%s1349_s12 + $0x38] sm:$0xff] }
  0x4f   : > { %456 = vmatpush.msra.mxu2 %v442_v27  ;;  %479 = vmatpush.msra.mxu3 %v443_v28  ;;  %v434_v43 = vld [vmem:[%s1355_s0 + $0x70] sm:$0xff]  ;;  %v435_v44 = vld [vmem:[%s1355_s0 + $0x78] sm:$0xff]  ;;  %v346_v45 = vld [vmem:[%s1349_s12 + $0x20] sm:$0xff] }
  0x50   : > { %381 = vmatpush.msra.mxu0 %v358_v21  ;;  %404 = vmatpush.msra.mxu1 %v359_v22  ;;  %v347_v46 = vld [vmem:[%s1349_s12 + $0x28] sm:$0xff]  ;;  %v432_v47 = vld [vmem:[%s1355_s0 + $0x60] sm:$0xff]  ;;  %v344_v49 = vld [vmem:[%s1349_s12 + $0x10] sm:$0xff] }
  0x51   : > { %457 = vmatpush.msra.mxu2 %v440_v31  ;;  %480 = vmatpush.msra.mxu3 %v441_v32  ;;  %v433_v48 = vld [vmem:[%s1355_s0 + $0x68] sm:$0xff]  ;;  %v345_v50 = vld [vmem:[%s1349_s12 + $0x18] sm:$0xff]  ;;  %v430_v51 = vld [vmem:[%s1355_s0 + $0x50] sm:$0xff] }
  0x52   : > { %382 = vmatpush.msra.mxu0 %v356_v25  ;;  %405 = vmatpush.msra.mxu1 %v357_v26  ;;  %v431_v52 = vld [vmem:[%s1355_s0 + $0x58] sm:$0xff]  ;;  %v342_v53 = vld [vmem:[%s1349_s12] sm:$0xff]  ;;  %v343_v54 = vld [vmem:[%s1349_s12 + $0x8] sm:$0xff] }
  0x53   : > { %458 = vmatpush.msra.mxu2 %v438_v35  ;;  %481 = vmatpush.msra.mxu3 %v439_v36  ;;  %v340_v55 = vld [vmem:[#allocation3] sm:$0xff]  ;;  %v428_v56 = vld [vmem:[%s1355_s0 + $0x40] sm:$0xff]  ;;  %v429_v57 = vld [vmem:[%s1355_s0 + $0x48] sm:$0xff] }
  0x54   : > { %383 = vmatpush.msra.mxu0 %v354_v29  ;;  %406 = vmatpush.msra.mxu1 %v355_v30  ;;  %v426_v58 = vld [vmem:[%s1355_s0 + $0x30] sm:$0xff]  ;;  %v427_v59 = vld [vmem:[%s1355_s0 + $0x38] sm:$0xff]  ;;  %v424_v60 = vld [vmem:[%s1355_s0 + $0x20] sm:$0xff] }
  0x55   : > { %459 = vmatpush.msra.mxu2 %v436_v39  ;;  %482 = vmatpush.msra.mxu3 %v437_v40  ;;  %v425_v61 = vld [vmem:[%s1355_s0 + $0x28] sm:$0xff]  ;;  %v422_v62 = vld [vmem:[%s1355_s0 + $0x10] sm:$0xff]  ;;  %v423_v63 = vld [vmem:[%s1355_s0 + $0x18] sm:$0xff] }
  0x56   : > { %384 = vmatpush.msra.mxu0 %v352_v33  ;;  %407 = vmatpush.msra.mxu1 %v353_v34  ;;  %v341_v0 = vld [vmem:[#allocation3 + $0x8] sm:$0xff]  ;;  %v420_v1 = vld [vmem:[%s1355_s0] sm:$0xff]  ;;  %v421_v2 = vld [vmem:[%s1355_s0 + $0x8] sm:$0xff] }
  0x57   : > { %460 = vmatpush.msra.mxu2 %v434_v43  ;;  %483 = vmatpush.msra.mxu3 %v435_v44  ;;  %v599_v3 = vld [vmem:[%s1357_s26 + $0x78] sm:$0xff]  ;;  %v598_v5 = vld [vmem:[%s1357_s26 + $0x70] sm:$0xff]  ;;  %v597_v7 = vld [vmem:[%s1357_s26 + $0x68] sm:$0xff] }
  0x58   : > { %385 = vmatpush.msra.mxu0 %v350_v37  ;;  %408 = vmatpush.msra.mxu1 %v351_v38  ;;  %v615_v4 = vld [vmem:[%s1357_s26 + $0xf8] sm:$0xff]  ;;  %v614_v6 = vld [vmem:[%s1357_s26 + $0xf0] sm:$0xff]  ;;  %v613_v8 = vld [vmem:[%s1357_s26 + $0xe8] sm:$0xff] }
  0x59   : > { %461 = vmatpush.msra.mxu2 %v432_v47  ;;  %484 = vmatpush.msra.mxu3 %v433_v48  ;;  %v596_v9 = vld [vmem:[%s1357_s26 + $0x60] sm:$0xff]  ;;  %v595_v11 = vld [vmem:[%s1357_s26 + $0x58] sm:$0xff]  ;;  %v594_v13 = vld [vmem:[%s1357_s26 + $0x50] sm:$0xff] }
  0x5a   : > { %386 = vmatpush.msra.mxu0 %v348_v41  ;;  %409 = vmatpush.msra.mxu1 %v349_v42  ;;  %v612_v10 = vld [vmem:[%s1357_s26 + $0xe0] sm:$0xff]  ;;  %v611_v12 = vld [vmem:[%s1357_s26 + $0xd8] sm:$0xff]  ;;  %v610_v14 = vld [vmem:[%s1357_s26 + $0xd0] sm:$0xff] }
  0x5b   : > { %462 = vmatpush.msra.mxu2 %v430_v51  ;;  %485 = vmatpush.msra.mxu3 %v431_v52  ;;  %v593_v15 = vld [vmem:[%s1357_s26 + $0x48] sm:$0xff]  ;;  %v592_v17 = vld [vmem:[%s1357_s26 + $0x40] sm:$0xff]  ;;  %v591_v19 = vld [vmem:[%s1357_s26 + $0x38] sm:$0xff] }
  0x5c   : > { %387 = vmatpush.msra.mxu0 %v346_v45  ;;  %410 = vmatpush.msra.mxu1 %v347_v46  ;;  %v609_v16 = vld [vmem:[%s1357_s26 + $0xc8] sm:$0xff]  ;;  %v608_v18 = vld [vmem:[%s1357_s26 + $0xc0] sm:$0xff]  ;;  %v607_v20 = vld [vmem:[%s1357_s26 + $0xb8] sm:$0xff] }
  0x5d   : > { %463 = vmatpush.msra.mxu2 %v428_v56  ;;  %486 = vmatpush.msra.mxu3 %v429_v57  ;;  %v590_v21 = vld [vmem:[%s1357_s26 + $0x30] sm:$0xff]  ;;  %v589_v23 = vld [vmem:[%s1357_s26 + $0x28] sm:$0xff]  ;;  %v588_v25 = vld [vmem:[%s1357_s26 + $0x20] sm:$0xff] }
  0x5e   : > { %388 = vmatpush.msra.mxu0 %v344_v49  ;;  %411 = vmatpush.msra.mxu1 %v345_v50  ;;  %v606_v22 = vld [vmem:[%s1357_s26 + $0xb0] sm:$0xff]  ;;  %v605_v24 = vld [vmem:[%s1357_s26 + $0xa8] sm:$0xff]  ;;  %v604_v26 = vld [vmem:[%s1357_s26 + $0xa0] sm:$0xff] }
  0x5f   : > { %464 = vmatpush.msra.mxu2 %v426_v58  ;;  %487 = vmatpush.msra.mxu3 %v427_v59  ;;  %v587_v27 = vld [vmem:[%s1357_s26 + $0x18] sm:$0xff]  ;;  %v586_v29 = vld [vmem:[%s1357_s26 + $0x10] sm:$0xff]  ;;  %v585_v35 = vld [vmem:[%s1357_s26 + $0x8] sm:$0xff] }
  0x60   : > { %389 = vmatpush.msra.mxu0 %v342_v53  ;;  %412 = vmatpush.msra.mxu1 %v343_v54  ;;  %v603_v28 = vld [vmem:[%s1357_s26 + $0x98] sm:$0xff]  ;;  %v602_v30 = vld [vmem:[%s1357_s26 + $0x90] sm:$0xff]  ;;  %v601_v36 = vld [vmem:[%s1357_s26 + $0x88] sm:$0xff] }
  0x61   : > { %390 = vmatmul.f32.vlgmr.msra.gmra.mxu0 %v340_v55  ;;  %413 = vmatmul.f32.vlgmr.msra.gmra.mxu1 %v340_v55  ;;  %v584_v37 = vld [vmem:[%s1357_s26] sm:$0xff] }
  0x62   : > { %465 = vmatpush.msra.mxu2 %v424_v60  ;;  %488 = vmatpush.msra.mxu3 %v425_v61  ;;  %v600_v38 = vld [vmem:[%s1357_s26 + $0x80] sm:$0xff] }
  0x63   : > { %616 = vmatpush.msrb.mxu0 %v599_v3  ;;  %639 = vmatpush.msrb.mxu1 %v615_v4 }
  0x64   : > { %466 = vmatpush.msra.mxu2 %v422_v62  ;;  %489 = vmatpush.msra.mxu3 %v423_v63 }
  0x65   : > { %617 = vmatpush.msrb.mxu0 %v598_v5  ;;  %640 = vmatpush.msrb.mxu1 %v614_v6 }
  0x66   : > { %467 = vmatpush.msra.mxu2 %v420_v1  ;;  %490 = vmatpush.msra.mxu3 %v421_v2 }
  0x67   : > { %468 = vmatmul.f32.vlgmr.msra.gmra.mxu2 %v340_v55  ;;  %491 = vmatmul.f32.vlgmr.msra.gmra.mxu3 %v340_v55 }
  0x68   : > { %837 = vmatpush.msrb.mxu2 %v599_v3  ;;  %853 = vmatpush.msrb.mxu3 %v615_v4 }
  0x69   : > { %393 = vmatmul.f32.gmra.mxu0 %v341_v0  ;;  %416 = vmatmul.f32.gmra.mxu1 %v341_v0 }
  0x6a   : > { %838 = vmatpush.msrb.mxu2 %v598_v5  ;;  %854 = vmatpush.msrb.mxu3 %v614_v6 }
  0x6b   : > { %618 = vmatpush.msrb.mxu0 %v597_v7  ;;  %641 = vmatpush.msrb.mxu1 %v613_v8 }
  0x6c   : > { %839 = vmatpush.msrb.mxu2 %v597_v7  ;;  %855 = vmatpush.msrb.mxu3 %v613_v8 }
  0x6d   : > { %619 = vmatpush.msrb.mxu0 %v596_v9  ;;  %642 = vmatpush.msrb.mxu1 %v612_v10 }
  0x6e   : > { %840 = vmatpush.msrb.mxu2 %v596_v9  ;;  %856 = vmatpush.msrb.mxu3 %v612_v10 }
  0x6f   : > { %471 = vmatmul.f32.gmra.mxu2 %v341_v0  ;;  %494 = vmatmul.f32.gmra.mxu3 %v341_v0 }
  0x70   : > { %620 = vmatpush.msrb.mxu0 %v595_v11  ;;  %643 = vmatpush.msrb.mxu1 %v611_v12 }
  0x71   : > { %841 = vmatpush.msrb.mxu2 %v595_v11  ;;  %857 = vmatpush.msrb.mxu3 %v611_v12 }
  0x72   : > { %621 = vmatpush.msrb.mxu0 %v594_v13  ;;  %644 = vmatpush.msrb.mxu1 %v610_v14 }
  0x73   : > { %842 = vmatpush.msrb.mxu2 %v594_v13  ;;  %858 = vmatpush.msrb.mxu3 %v610_v14 }
  0x74   : > { %622 = vmatpush.msrb.mxu0 %v593_v15  ;;  %645 = vmatpush.msrb.mxu1 %v609_v16 }
  0x75   : > { %843 = vmatpush.msrb.mxu2 %v593_v15  ;;  %859 = vmatpush.msrb.mxu3 %v609_v16 }
  0x76   : > { %623 = vmatpush.msrb.mxu0 %v592_v17  ;;  %646 = vmatpush.msrb.mxu1 %v608_v18 }
  0x77   : > { %844 = vmatpush.msrb.mxu2 %v592_v17  ;;  %860 = vmatpush.msrb.mxu3 %v608_v18 }
  0x78   : > { %624 = vmatpush.msrb.mxu0 %v591_v19  ;;  %647 = vmatpush.msrb.mxu1 %v607_v20 }
  0x79   : > { %845 = vmatpush.msrb.mxu2 %v591_v19  ;;  %861 = vmatpush.msrb.mxu3 %v607_v20 }
  0x7a   : > { %625 = vmatpush.msrb.mxu0 %v590_v21  ;;  %648 = vmatpush.msrb.mxu1 %v606_v22 }
  0x7b   : > { %846 = vmatpush.msrb.mxu2 %v590_v21  ;;  %862 = vmatpush.msrb.mxu3 %v606_v22 }
  0x7c   : > { %626 = vmatpush.msrb.mxu0 %v589_v23  ;;  %649 = vmatpush.msrb.mxu1 %v605_v24 }
  0x7d   : > { %847 = vmatpush.msrb.mxu2 %v589_v23  ;;  %863 = vmatpush.msrb.mxu3 %v605_v24 }
  0x7e   : > { %627 = vmatpush.msrb.mxu0 %v588_v25  ;;  %650 = vmatpush.msrb.mxu1 %v604_v26 }
  0x7f   : > { %848 = vmatpush.msrb.mxu2 %v588_v25  ;;  %864 = vmatpush.msrb.mxu3 %v604_v26 }
  0x80   : > { %628 = vmatpush.msrb.mxu0 %v587_v27  ;;  %651 = vmatpush.msrb.mxu1 %v603_v28 }
  0x81   : > { %849 = vmatpush.msrb.mxu2 %v587_v27  ;;  %865 = vmatpush.msrb.mxu3 %v603_v28 }
  0x82   : > { %629 = vmatpush.msrb.mxu0 %v586_v29  ;;  %652 = vmatpush.msrb.mxu1 %v602_v30 }
  0x83   : > { %850 = vmatpush.msrb.mxu2 %v586_v29  ;;  %866 = vmatpush.msrb.mxu3 %v602_v30 }
  0x84   : > { %630 = vmatpush.msrb.mxu0 %v585_v35  ;;  %653 = vmatpush.msrb.mxu1 %v601_v36 }
  0x85   : > { %851 = vmatpush.msrb.mxu2 %v585_v35  ;;  %867 = vmatpush.msrb.mxu3 %v601_v36 }
  0x86   : > { %631 = vmatpush.msrb.mxu0 %v584_v37  ;;  %654 = vmatpush.msrb.mxu1 %v600_v38 }
  0x87   : > { %852 = vmatpush.msrb.mxu2 %v584_v37  ;;  %868 = vmatpush.msrb.mxu3 %v600_v38 }
  0xde   : > { %v1456_v31 = vpop.f32.mrf.mxu0  ;;  %v1458_v32 = vpop.f32.mrf.mxu1 }
  0xdf   : > { %v825_v33 = vmul.f32 -1.442695, %v1456_v31  ;;  %v826_v34 = vmul.f32 -1.442695, %v1458_v32 }
  0xe1   : > { %960 = vpow2.f32 %v825_v33 }
  0xe2   : > { %962 = vpow2.f32 %v826_v34 }
  0xe6   : > { %v1466_v39 = vpop.f32.mrf.mxu0  ;;  %v1468_v40 = vpop.f32.mrf.mxu1 }
  0xe7   : > { %v961_v41 = vpop.eup %960  ;;  %v827_v42 = vmul.f32 -1.442695, %v1466_v39  ;;  %v828_v45 = vmul.f32 -1.442695, %v1468_v40 }
  0xe8   : > { %v963_v43 = vpop.eup %962  ;;  %v510_v44 = vadd.f32 1.0, %v961_v41 }
  0xe9   : > { %v511_v46 = vadd.f32 1.0, %v963_v43  ;;  %964 = vpow2.f32 %v827_v42  ;;  %v582_v42 = vld [vmem:[#allocation2] sm:$0xff] }
  0xea   : > { %966 = vrcp.f32 %v510_v44  ;;  %v523_v56 = vand.u32 2147483647, %v510_v44  ;;  %v525_v57 = vand.u32 2147483648, %v510_v44  ;;  %vm519_vm2 = vweird.f32 %v510_v44  ;;  %v469_v3 = vpop.f32.mrf.mxu2  ;;  %v492_v13 = vpop.f32.mrf.mxu3 }
  0xeb   : > { %968 = vrcp.f32 %v511_v46  ;;  %v540_v60 = vand.u32 2147483648, %v511_v46  ;;  %v538_v62 = vand.u32 2147483647, %v511_v46  ;;  %vm534_vm4 = vweird.f32 %v511_v46 }
  0xec   : > { %970 = vpow2.f32 %v828_v45  ;;  %v526_v1 = vor.u32 1.1754944e-38, %v525_v57  ;;  %vm524_vm5 = vcmp.eq.f32.partialorder %v523_v56, 8.507059e+37 }
  0xed   : > { %v541_v5 = vor.u32 1.1754944e-38, %v540_v60  ;;  %vm539_vm7 = vcmp.eq.f32.partialorder %v538_v62, 8.507059e+37 }
  0xef   : > { %v965_v47 = vpop.eup %964 }
  0xf0   : > { %v967_v48 = vpop.eup %966  ;;  %v512_v49 = vadd.f32 1.0, %v965_v47 }
  0xf1   : > { %v969_v50 = vpop.eup %968  ;;  %v515_v51 = vmul.f32 %v967_v48, %v510_v44  ;;  %vm520_vm0 = vweird.f32 %v967_v48 }
  0xf2   : > { %v971_v52 = vpop.eup %970  ;;  %v530_v53 = vmul.f32 %v969_v50, %v511_v46  ;;  %972 = vrcp.f32 %v512_v49  ;;  %vm535_vm1 = vweird.f32 %v969_v50  ;;  %vm521_vm3 = vmor %vm519_vm2, %vm520_vm0  ;;  %v555_v15 = vand.u32 2147483648, %v512_v49  ;;  %v472_v30 = vpop.f32.mrf.mxu2 }
  0xf3   : > { %v516_v54 = vsub.f32 1.0, %v515_v51  ;;  %v513_v55 = vadd.f32 1.0, %v971_v52  ;;  %vm536_vm6 = vmor %vm534_vm4, %vm535_vm1  ;;  %v553_v18 = vand.u32 2147483647, %v512_v49  ;;  %vm549_vm9 = vweird.f32 %v512_v49  ;;  %v495_v36 = vpop.f32.mrf.mxu3 }
  0xf4   : > { %v531_v58 = vsub.f32 1.0, %v530_v53  ;;  %v556_v24 = vor.u32 1.1754944e-38, %v555_v15 }
  0xf5   : > { %v517_v59 = vmul.f32 %v967_v48, %v516_v54  ;;  %974 = vrcp.f32 %v513_v55  ;;  %v570_v23 = vand.u32 2147483648, %v513_v55  ;;  %v568_v26 = vand.u32 2147483647, %v513_v55 }
  0xf6   : > { %v532_v61 = vmul.f32 %v969_v50, %v531_v58  ;;  %vm554_vm12 = vcmp.eq.f32.partialorder %v553_v18, 8.507059e+37  ;;  %vm564_vm13 = vweird.f32 %v513_v55 }
  0xf7   : > { %v518_v63 = vadd.f32 %v967_v48, %v517_v59  ;;  %vm569_vm15 = vcmp.eq.f32.partialorder %v568_v26, 8.507059e+37 }
  0xf8   : > { %v973_v0 = vpop.eup %972  ;;  %v533_v2 = vadd.f32 %v969_v50, %v532_v61 }
  0xf9   : > { %v522_v4 = vsel %vm521_vm3, %v967_v48, %v518_v63  ;;  %v545_v6 = vmul.f32 %v973_v0, %v512_v49  ;;  %vm550_vm8 = vweird.f32 %v973_v0 }
  0xfa   : > { %v527_v7 = vsel %vm524_vm5, %v526_v1, %v522_v4  ;;  %v537_v8 = vsel %vm536_vm6, %v969_v50, %v533_v2  ;;  %vm551_vm10 = vmor %vm549_vm9, %vm550_vm8 }
  0xfb   : > { %v975_v9 = vpop.eup %974  ;;  %v574_v10 = vmul.f32 %v527_v7, %v1456_v31  ;;  %v542_v11 = vsel %vm539_vm7, %v541_v5, %v537_v8  ;;  %v546_v12 = vsub.f32 1.0, %v545_v6 }
  0xfc   : > { %v575_v14 = vmul.f32 %v542_v11, %v1458_v32  ;;  %v560_v16 = vmul.f32 %v975_v9, %v513_v55  ;;  %vm565_vm11 = vweird.f32 %v975_v9  ;;  %v571_v32 = vor.u32 1.1754944e-38, %v570_v23 }
  0xfd   : > { %v547_v17 = vmul.f32 %v973_v0, %v546_v12  ;;  %v578_v19 = vmul.f32 %v574_v10, %v469_v3  ;;  %vm566_vm14 = vmor %vm564_vm13, %vm565_vm11 }
  0xfe   : > { %v561_v20 = vsub.f32 1.0, %v560_v16  ;;  %v579_v21 = vmul.f32 %v575_v14, %v492_v13 }
  0xff   : > { %v548_v22 = vadd.f32 %v973_v0, %v547_v17  ;;  %632 = vmatmul.f32.vlgmr.msrb.gmra.mxu0 %v578_v19 }
 0x100   : > { %v562_v25 = vmul.f32 %v975_v9, %v561_v20  ;;  %655 = vmatmul.f32.vlgmr.msrb.gmra.mxu1 %v579_v21 }
 0x101   : > { %v552_v27 = vsel %vm551_vm10, %v973_v0, %v548_v22 }
 0x102   : > { %v557_v28 = vsel %vm554_vm12, %v556_v24, %v552_v27  ;;  %v563_v29 = vadd.f32 %v975_v9, %v562_v25 }
 0x103   : > { %v576_v31 = vmul.f32 %v557_v28, %v1466_v39  ;;  %v583_v39 = vld [vmem:[#allocation2 + $0x8] sm:$0xff] }
 0x104   : > { %v567_v33 = vsel %vm566_vm14, %v975_v9, %v563_v29 }
 0x105   : > { %v572_v34 = vsel %vm569_vm15, %v571_v32, %v567_v33  ;;  %v580_v35 = vmul.f32 %v576_v31, %v472_v30 }
 0x106   : > { %v577_v37 = vmul.f32 %v572_v34, %v1468_v40 }
 0x107   : > { %635 = vmatmul.f32.vlgmr.msrb.gmra.mxu2 %v580_v35 }
 0x108   : > { %v581_v38 = vmul.f32 %v577_v37, %v495_v36 }
 0x10a   : > { %658 = vmatmul.f32.vlgmr.msrb.gmra.mxu3 %v581_v38 }
 0x17c   : > { %v633_v41 = vpop.f32.mrf.mxu0 }
 0x17d   : > { %v656_v43 = vpop.f32.mrf.mxu1 }
 0x17e   : > { %v657_v44 = vadd.f32 %v656_v43, %v633_v41 }
 0x180   : > { %v662_v45 = vadd.f32 %v657_v44, %v582_v42 }
 0x182   : > { %664 = vst [vmem:[#allocation2] sm:$0xff] %v662_v45 }
 0x18a   : > { %v636_v46 = vpop.f32.mrf.mxu2 }
 0x18d   : > { %v659_v47 = vpop.f32.mrf.mxu3 }
 0x18e   : > { %v660_v48 = vadd.f32 %v659_v47, %v636_v46  ;;  %669 = sbr.rel (%p829_p2) target bundleno = 411 (0x19b), region = 60 }
 0x190   : > { %v663_v49 = vadd.f32 %v660_v48, %v583_v39 }
 0x192   : > { %665 = vst [vmem:[#allocation2 + $0x8] sm:$0xff] %v663_v49 }
 0x193   : > { %v670_v50 = vld [vmem:[#allocation2] sm:$0xff] }
 0x194   : > { %672 = vst [vmem:[#allocation11] sm:$0xff] %v670_v50 }
 0x199   : > { %v671_v40 = vld [vmem:[#allocation2 + $0x8] sm:$0xff] }
 0x19a   : > { %673 = vst [vmem:[#allocation11 + $0x8] sm:$0xff] %v671_v40 }
 0x19b PF: > { %p900_p3 = scmp.eq.s32.totalorder %s1301_s5, 1  ;;  %s684_s13 = sshll.u32 %s1503_s4, 4  ;;  %s685_s13 = int_to_ptr.hbm [resolvable:$true] %s684_s13 }
 0x19c   : > { %s1195_s14 = smov [#allocation11]   ;;  %s1196_s25 = smov 128  }
 0x19d   : > { %s682_s30 = sshll.u32 %s1195_s14, 4  ;;  %s1197_s27 = smov 8   ;;  %s683_s30 = int_to_ptr.vmem [resolvable:$true] %s682_s30 }
 0x19e   : > { %880 = dma.vmem_to_hbm [thread:$0]  (%p900_p3), %s683_s30, 256, %s685_s13, [#allocation5], %s1196_s25, %s1196_s25, %s1197_s27  }
 0x19f   : > { %1161 = dma.done.wait (%p900_p3), [#allocation5], 256  }
 0x1a0   : > { %1163 = vsyncadd (%p900_p3), [#allocation5], 4294967040 }
 0x1a1 PF: > { %s22_s20 = sadd.s32 1, %s1186_s20   ;;  %s1519_s18 = sld [smem:[#allocation17_spill]] }
 0x1a2   : > { %p19_p4 = scmp.ge.s32.totalorder %s22_s20, 4   ;;  %s1520_s5 = sld [smem:[#allocation16_spill]] }
 0x1a3   : > { %s1521_s15 = smov %s1170_s16  ;;  %s1522_s16 = smov %s1174_s17 }
 0x1a4   :  { %21 = sbr.rel (!%p19_p4) target bundleno = 12 (0xc), region = 112 }
 0x1a7   : > { %s1523_s17 = smov %s1519_s18  ;;  %s1524_s18 = smov %s1182_s19 }
 0x1a8   : > { %s1525_s19 = smov %s1520_s5 }
 0x1a9   :  { %701 = vsyncpa [#allocation4], 1 }
 0x1aa   :  { %703 = vsyncpa [#allocation4 + $0x1], 1 }
 0x1ab   :  { %704 = vsyncpa [#allocation7], 1 }
 0x1ac   :  { %706 = vsyncpa [#allocation7 + $0x1], 1 }
 0x1ad   :  { %707 = vsyncpa [#allocation10], 1 }
 0x1ae   :  { %709 = vsyncpa [#allocation10 + $0x1], 1 }
 0x1af   :  { %710 = vsyncpa [#allocation5], 1 }
 0x1b0   :  { %712 = vsyncpa [#allocation5 + $0x1], 1 }

</bundles_post_ra>
